<compile_context>
chip_gen: v7x
topology: tpu7x:2x2x1
jax: 0.10.0
libtpu: 0.0.40
codegen_flags: <defaults>
</compile_context>

<pallas_src>
import jax
import jax.numpy as jnp
from jax import lax
from jax.experimental import pallas as pl
from jax.experimental.pallas import tpu as pltpu


def _stoch_binarize_kernel(seed_ref, x_ref, o_ref):
    tile_rows, cols = x_ref.shape
    tile = pl.program_id(0).astype(jnp.uint32)
    seed_u = seed_ref[0].astype(jnp.uint32)

    # Global flat element index of every element in this tile (uint32, wraps OK).
    row = lax.broadcasted_iota(jnp.int32, (tile_rows, cols), 0).astype(jnp.uint32)
    col = lax.broadcasted_iota(jnp.int32, (tile_rows, cols), 1).astype(jnp.uint32)
    grow = row + tile * jnp.uint32(tile_rows)
    idx = grow * jnp.uint32(cols) + col

    # Counter-based PRNG: mix the index with the seed, then murmur3 fmix32.
    h = idx ^ (seed_u * jnp.uint32(0x9E3779B9))
    h = h ^ (h >> jnp.uint32(16))
    h = h * jnp.uint32(0x85EBCA6B)
    h = h ^ (h >> jnp.uint32(13))
    h = h * jnp.uint32(0xC2B2AE35)
    h = h ^ (h >> jnp.uint32(16))

    # Top 24 bits -> uniform in [0, 1).
    u = (h >> jnp.uint32(8)).astype(jnp.float32) * jnp.float32(1.0 / (1 << 24))

    # round(clamp((x+1)/2 + (u-0.5), 0, 1))*2 - 1  ==  sign(x + 2u - 1)
    x = x_ref[...].astype(jnp.float32)
    v = x + (jnp.float32(2.0) * u - jnp.float32(1.0))
    o_ref[...] = jnp.where(v >= jnp.float32(0.0),
                           jnp.float32(1.0),
                           jnp.float32(-1.0)).astype(o_ref.dtype)


def stochastic_input_binarizer(x: jax.Array, seed: int = 0) -> jax.Array:
    """Stochastic sign binarization of x (any shape), matching SignActivationStochastic."""
    orig_shape = x.shape
    orig_dtype = x.dtype
    total = x.size

    COLS = 1024            # lane-dense last dim (large multiple of 128)
    MAX_TILE_ROWS = 512    # 512x1024 fp32 block = 2 MiB -> fully pipelined on v5e/v6e/v7x

    rows = -(-total // COLS)                         # ceil
    tile_rows = min(MAX_TILE_ROWS, rows)
    tile_rows = ((tile_rows + 7) // 8) * 8           # sublane (8) alignment
    rows_padded = ((rows + tile_rows - 1) // tile_rows) * tile_rows
    padded_total = rows_padded * COLS

    flat = x.reshape(-1)
    if padded_total != total:
        flat = jnp.pad(flat, (0, padded_total - total))
    x2d = flat.reshape(rows_padded, COLS)

    seed_arr = jnp.asarray([seed], dtype=jnp.int32)

    out2d = pl.pallas_call(
        _stoch_binarize_kernel,
        out_shape=jax.ShapeDtypeStruct((rows_padded, COLS), orig_dtype),
        grid_spec=pltpu.PrefetchScalarGridSpec(
            num_scalar_prefetch=1,
            grid=(rows_padded // tile_rows,),
            in_specs=[pl.BlockSpec((tile_rows, COLS), lambda i, seed: (i, 0))],
            out_specs=pl.BlockSpec((tile_rows, COLS), lambda i, seed: (i, 0)),
        ),
        compiler_params=pltpu.CompilerParams(
            dimension_semantics=("parallel",),   # shard tiles across v7x's 2 TCs
        ),
    )(seed_arr, x2d)

    return out2d.reshape(-1)[:total].reshape(orig_shape)


# TODO(synk): backward pass (hardtanh STE) is not implemented; forward only.

if __name__ == "__main__":
    key = jax.random.PRNGKey(0)
    # NCHW input like the PyTorch module would see from a conv stack.
    x = jax.random.normal(key, (2, 4, 16, 16), dtype=jnp.float32)

    out = stochastic_input_binarizer(x, seed=0)
    out = jax.block_until_ready(out)

    # Sanity checks: same shape/dtype, outputs strictly in {-1, +1}.
    assert out.shape == x.shape and out.dtype == x.dtype
    assert bool(jnp.all(jnp.abs(out) == 1.0))

    # Strongly positive / negative inputs binarize deterministically.
    big = jax.block_until_ready(
        stochastic_input_binarizer(jnp.full((1, 1, 8, 16), 5.0), seed=1))
    assert bool(jnp.all(big == 1.0))
    small = jax.block_until_ready(
        stochastic_input_binarizer(jnp.full((1, 1, 8, 16), -5.0), seed=2))
    assert bool(jnp.all(small == -1.0))

    print("KERNEL_OK")
</pallas_src>

<mosaic_0001>
module attributes {stable_mosaic.version = 11 : i64} {
  func.func @_stoch_binarize_kernel(%arg0: i32, %arg1: memref<1xi32, #tpu.memory_space<smem>>, %arg2: memref<8x1024xf32, #tpu.memory_space<vmem>>, %arg3: memref<8x1024xf32, #tpu.memory_space<vmem>>) attributes {dimension_semantics = [#tpu.dimension_semantics<parallel>], iteration_bounds = array<i64: 1>, scalar_prefetch = 1 : i64, scratch_operands = 0 : i64, tpu.core_type = #tpu.core_type<tc>, window_params = [{transform_indices = @transform_0, window_bounds = array<i64: 8, 1024>}, {transform_indices = @transform_1, window_bounds = array<i64: 8, 1024>}]} {
    %c0 = arith.constant 0 : index
    %0 = memref.load %arg1[%c0] : memref<1xi32, #tpu.memory_space<smem>>
    %1 = tpu.iota {dimensions = array<i32: 0>} : vector<8x1024xi32>
    %2 = tpu.iota {dimensions = array<i32: 1>} : vector<8x1024xi32>
    %c8_i32 = arith.constant 8 : i32
    %3 = arith.muli %arg0, %c8_i32 : i32
    %4 = vector.broadcast %3 : i32 to vector<8x1024xi32>
    %5 = arith.addi %1, %4 : vector<8x1024xi32>
    %c1024_i32 = arith.constant 1024 : i32
    %6 = vector.broadcast %c1024_i32 : i32 to vector<8x1024xi32>
    %7 = arith.muli %5, %6 : vector<8x1024xi32>
    %8 = arith.addi %7, %2 : vector<8x1024xi32>
    %c-1640531527_i32 = arith.constant -1640531527 : i32
    %9 = arith.muli %0, %c-1640531527_i32 : i32
    %10 = vector.broadcast %9 : i32 to vector<8x1024xi32>
    %11 = arith.xori %8, %10 : vector<8x1024xi32>
    %c16_i32 = arith.constant 16 : i32
    %12 = vector.broadcast %c16_i32 : i32 to vector<8x1024xi32>
    %13 = arith.shrui %11, %12 : vector<8x1024xi32>
    %14 = arith.xori %11, %13 : vector<8x1024xi32>
    %c-2048144789_i32 = arith.constant -2048144789 : i32
    %15 = vector.broadcast %c-2048144789_i32 : i32 to vector<8x1024xi32>
    %16 = arith.muli %14, %15 : vector<8x1024xi32>
    %c13_i32 = arith.constant 13 : i32
    %17 = vector.broadcast %c13_i32 : i32 to vector<8x1024xi32>
    %18 = arith.shrui %16, %17 : vector<8x1024xi32>
    %19 = arith.xori %16, %18 : vector<8x1024xi32>
    %c-1028477387_i32 = arith.constant -1028477387 : i32
    %20 = vector.broadcast %c-1028477387_i32 : i32 to vector<8x1024xi32>
    %21 = arith.muli %19, %20 : vector<8x1024xi32>
    %c16_i32_0 = arith.constant 16 : i32
    %22 = vector.broadcast %c16_i32_0 : i32 to vector<8x1024xi32>
    %23 = arith.shrui %21, %22 : vector<8x1024xi32>
    %24 = arith.xori %21, %23 : vector<8x1024xi32>
    %c8_i32_1 = arith.constant 8 : i32
    %25 = vector.broadcast %c8_i32_1 : i32 to vector<8x1024xi32>
    %26 = arith.shrui %24, %25 : vector<8x1024xi32>
    %27 = arith.uitofp %26 : vector<8x1024xi32> to vector<8x1024xf32>
    %cst = arith.constant 5.96046448E-8 : f32
    %28 = vector.broadcast %cst : f32 to vector<8x1024xf32>
    %29 = arith.mulf %27, %28 : vector<8x1024xf32>
    %c0_2 = arith.constant 0 : index
    %c0_3 = arith.constant 0 : index
    %30 = vector.load %arg2[%c0_2, %c0_3] : memref<8x1024xf32, #tpu.memory_space<vmem>>, vector<8x1024xf32>
    %cst_4 = arith.constant 2.000000e+00 : f32
    %31 = vector.broadcast %cst_4 : f32 to vector<8x1024xf32>
    %32 = arith.mulf %31, %29 : vector<8x1024xf32>
    %cst_5 = arith.constant 1.000000e+00 : f32
    %33 = vector.broadcast %cst_5 : f32 to vector<8x1024xf32>
    %34 = arith.subf %32, %33 : vector<8x1024xf32>
    %35 = arith.addf %30, %34 : vector<8x1024xf32>
    %cst_6 = arith.constant 0.000000e+00 : f32
    %36 = vector.broadcast %cst_6 : f32 to vector<8x1024xf32>
    %37 = arith.cmpf oge, %35, %36 : vector<8x1024xf32>
    %cst_7 = arith.constant 1.000000e+00 : f32
    %cst_8 = arith.constant -1.000000e+00 : f32
    %38 = vector.broadcast %cst_7 : f32 to vector<8x1024xf32>
    %39 = vector.broadcast %cst_8 : f32 to vector<8x1024xf32>
    %40 = arith.select %37, %38, %39 : vector<8x1024xi1>, vector<8x1024xf32>
    %c0_9 = arith.constant 0 : index
    %c0_10 = arith.constant 0 : index
    %41 = vector.load %arg3[%c0_9, %c0_10] : memref<8x1024xf32, #tpu.memory_space<vmem>>, vector<8x1024xf32>
    tpu.vector_store %arg3[%c0_9, %c0_10], %40 {strides = array<i32>} : memref<8x1024xf32, #tpu.memory_space<vmem>>, vector<8x1024xf32>,
    return
  }
  func.func @transform_0(%arg0: i32, %arg1: memref<1xi32, #tpu.memory_space<smem>>) -> (i32, i32) {
    %c0_i32 = arith.constant 0 : i32
    %c0_i32_0 = arith.constant 0 : i32
    return %arg0, %c0_i32 : i32, i32
  }
  func.func @transform_1(%arg0: i32, %arg1: memref<1xi32, #tpu.memory_space<smem>>) -> (i32, i32) {
    %c0_i32 = arith.constant 0 : i32
    %c0_i32_0 = arith.constant 0 : i32
    return %arg0, %c0_i32 : i32, i32
  }
}

</mosaic_0001>

<bundles_post_ra>
// kernel: tpu_custom_call.1
= control target key start
LH: loop header
LB: loop body
LE: loop exit
PB: predicated region body
PF: predicated region fallthrough
CT: control target
= control target key end

     0   :  { %8 = vsyncpa [#allocation5], 0  ;;  %s367_s0 = inlined_call_operand.<no memory space> [shape: s32[1], index: 0, kind: input, shape index: {}]   ;;  %s368_s1 = inlined_call_operand.hbm [shape: f32[8,1024], index: 1, kind: input, shape index: {}]   ;;  %s369_s2 = inlined_call_operand.hbm [shape: f32[8,1024], index: 2, kind: output, shape index: {}]  }
   0x1   :  { %9 = vsyncpa [#allocation6], 0  ;;  %s315_s9 = smov [#allocation4]   ;;  %s267_s13 = scalar_lea.hbm %s368_s1, 1024 }
   0x2   :  { %s16_s10 = sshll.u32 %s315_s9, 4  ;;  %p268_p0 = scmp.ne.s32.totalorder %s368_s1, %s267_s13  ;;  %s17_s10 = int_to_ptr.vmem [resolvable:$true] %s16_s10 }
   0x3   :  { %p271_p1 = scmp.lt.u32.totalorder %s267_s13, %s368_s1 }
   0x5   :  { %p273_p2 = pnand %p271_p1, %p268_p0 }
   0x7   :  { %276 = shalt.err (!%p273_p2)
}
   0x8   :  { %s277_s18 = scalar_lea.vmem %s17_s10, 1024  ;;  %p282_p4 = scmp.lt.s32.totalorder %s17_s10, %s17_s10 }
   0x9   :  { %p278_p3 = scmp.ne.s32.totalorder %s17_s10, %s277_s18  ;;  %p283_p5 = scmp.lt.s32.totalorder %s277_s18, %s277_s18 }
   0xb   :  { %p284_p6 = por %p283_p5, %p282_p4 }
   0xd   :  { %p285_p7 = pnand %p284_p6, %p278_p3 }
   0xf   :  { %288 = shalt.err (!%p285_p7)
}
  0x10   :  { %19 = dma.hbm_to_vmem [thread:$0]  %s368_s1, 1024, %s17_s10, [#allocation5]  }
  0x11   :  { %311 = dma.done.wait [#allocation5], 1024  }
  0x12   :  { %312 = vsyncadd [#allocation5], 4294966272  ;;  %v24_v0 = vlaneseq  ;;  %s47_s23 = smul.u32 2654435769, %s367_s0  ;;  %s317_s0 = smov [#allocation7]  }
  0x13   :  { %s247_s1 = sshll.u32 %s317_s0, 4  ;;  %s248_s1 = int_to_ptr.vmem [resolvable:$true] %s247_s1 }
  0x14   :  { %v25_v1 = vshrl.u32 %v24_v0, 7  ;;  %v27_v2 = vand.u32 127, %v24_v0  ;;  %v48_v3 = vstv %s47_s23  ;;  %s289_s24 = scalar_lea.vmem %s248_s1, 1024  ;;  %p294_p9 = scmp.lt.s32.totalorder %s248_s1, %s248_s1 }
  0x15   :  { %p290_p8 = scmp.ne.s32.totalorder %s248_s1, %s289_s24  ;;  %p295_p10 = scmp.lt.s32.totalorder %s289_s24, %s289_s24 }
  0x16   :  { %v38_v4 = vmul.u32 1024, %v25_v1  ;;  %v28_v5 = vadd.s32 128, %v27_v2  ;;  %v29_v6 = vadd.s32 256, %v27_v2  ;;  %v30_v7 = vadd.s32 384, %v27_v2 }
  0x17   :  { %v31_v8 = vadd.s32 512, %v27_v2  ;;  %v32_v9 = vadd.s32 640, %v27_v2  ;;  %v33_v10 = vadd.s32 768, %v27_v2  ;;  %v34_v11 = vadd.s32 896, %v27_v2  ;;  %p296_p11 = por %p295_p10, %p294_p9 }
  0x18   :  { %v39_v12 = vadd.s32 %v38_v4, %v27_v2  ;;  %v40_v13 = vadd.s32 %v38_v4, %v28_v5  ;;  %v41_v14 = vadd.s32 %v38_v4, %v29_v6  ;;  %v42_v15 = vadd.s32 %v38_v4, %v30_v7 }
  0x19   :  { %v43_v16 = vadd.s32 %v38_v4, %v31_v8  ;;  %v44_v17 = vadd.s32 %v38_v4, %v32_v9  ;;  %v45_v18 = vadd.s32 %v38_v4, %v33_v10  ;;  %v46_v19 = vadd.s32 %v38_v4, %v34_v11  ;;  %p297_p12 = pnand %p296_p11, %p290_p8 }
  0x1a   :  { %v49_v20 = vxor.u32 %v48_v3, %v39_v12  ;;  %v50_v21 = vxor.u32 %v48_v3, %v40_v13  ;;  %v51_v22 = vxor.u32 %v48_v3, %v41_v14  ;;  %v52_v23 = vxor.u32 %v48_v3, %v42_v15 }
  0x1b   :  { %v53_v24 = vxor.u32 %v48_v3, %v43_v16  ;;  %v54_v25 = vxor.u32 %v48_v3, %v44_v17  ;;  %v55_v26 = vxor.u32 %v48_v3, %v45_v18  ;;  %v56_v27 = vxor.u32 %v48_v3, %v46_v19 }
  0x1c   :  { %v57_v28 = vshrl.u32 %v49_v20, 16  ;;  %v58_v29 = vshrl.u32 %v50_v21, 16  ;;  %v59_v30 = vshrl.u32 %v51_v22, 16  ;;  %v60_v31 = vshrl.u32 %v52_v23, 16 }
  0x1d   :  { %v61_v32 = vshrl.u32 %v53_v24, 16  ;;  %v62_v33 = vshrl.u32 %v54_v25, 16  ;;  %v63_v34 = vshrl.u32 %v55_v26, 16  ;;  %v64_v35 = vshrl.u32 %v56_v27, 16 }
  0x1e   :  { %v65_v36 = vxor.u32 %v57_v28, %v49_v20  ;;  %v66_v37 = vxor.u32 %v58_v29, %v50_v21  ;;  %v67_v38 = vxor.u32 %v59_v30, %v51_v22  ;;  %v68_v39 = vxor.u32 %v60_v31, %v52_v23 }
  0x1f   :  { %v69_v40 = vxor.u32 %v61_v32, %v53_v24  ;;  %v70_v41 = vxor.u32 %v62_v33, %v54_v25  ;;  %v71_v42 = vxor.u32 %v63_v34, %v55_v26  ;;  %v72_v43 = vxor.u32 %v64_v35, %v56_v27 }
  0x20   :  { %v73_v44 = vmul.u32 2246822507, %v65_v36  ;;  %v74_v45 = vmul.u32 2246822507, %v66_v37 }
  0x21   :  { %v75_v46 = vmul.u32 2246822507, %v67_v38  ;;  %v76_v47 = vmul.u32 2246822507, %v68_v39 }
  0x22   :  { %v81_v48 = vshrl.u32 %v73_v44, 13  ;;  %v82_v49 = vshrl.u32 %v74_v45, 13  ;;  %v77_v50 = vmul.u32 2246822507, %v69_v40  ;;  %v78_v51 = vmul.u32 2246822507, %v70_v41 }
  0x23   :  { %v83_v52 = vshrl.u32 %v75_v46, 13  ;;  %v84_v53 = vshrl.u32 %v76_v47, 13  ;;  %v79_v54 = vmul.u32 2246822507, %v71_v42  ;;  %v80_v55 = vmul.u32 2246822507, %v72_v43 }
  0x24   :  { %v89_v56 = vxor.u32 %v81_v48, %v73_v44  ;;  %v90_v57 = vxor.u32 %v82_v49, %v74_v45  ;;  %v85_v58 = vshrl.u32 %v77_v50, 13  ;;  %v86_v59 = vshrl.u32 %v78_v51, 13 }
  0x25   :  { %v91_v60 = vxor.u32 %v83_v52, %v75_v46  ;;  %v92_v61 = vxor.u32 %v84_v53, %v76_v47  ;;  %v87_v62 = vshrl.u32 %v79_v54, 13  ;;  %v88_v63 = vshrl.u32 %v80_v55, 13 }
  0x26   :  { %v97_v0 = vmul.u32 3266489909, %v89_v56  ;;  %v98_v1 = vmul.u32 3266489909, %v90_v57  ;;  %v93_v2 = vxor.u32 %v85_v58, %v77_v50  ;;  %v94_v3 = vxor.u32 %v86_v59, %v78_v51 }
  0x27   :  { %v99_v4 = vmul.u32 3266489909, %v91_v60  ;;  %v100_v5 = vmul.u32 3266489909, %v92_v61  ;;  %v95_v6 = vxor.u32 %v87_v62, %v79_v54  ;;  %v96_v7 = vxor.u32 %v88_v63, %v80_v55 }
  0x28   :  { %v105_v8 = vshrl.u32 %v97_v0, 16  ;;  %v106_v9 = vshrl.u32 %v98_v1, 16  ;;  %v101_v10 = vmul.u32 3266489909, %v93_v2  ;;  %v102_v11 = vmul.u32 3266489909, %v94_v3 }
  0x29   :  { %v107_v12 = vshrl.u32 %v99_v4, 16  ;;  %v108_v13 = vshrl.u32 %v100_v5, 16  ;;  %v103_v14 = vmul.u32 3266489909, %v95_v6  ;;  %v104_v15 = vmul.u32 3266489909, %v96_v7 }
  0x2a   :  { %v113_v16 = vxor.u32 %v105_v8, %v97_v0  ;;  %v114_v17 = vxor.u32 %v106_v9, %v98_v1  ;;  %v109_v18 = vshrl.u32 %v101_v10, 16  ;;  %v110_v19 = vshrl.u32 %v102_v11, 16 }
  0x2b   :  { %v115_v20 = vxor.u32 %v107_v12, %v99_v4  ;;  %v116_v21 = vxor.u32 %v108_v13, %v100_v5  ;;  %v111_v22 = vshrl.u32 %v103_v14, 16  ;;  %v112_v23 = vshrl.u32 %v104_v15, 16  ;;  %v185_v12 = vld [vmem:[#allocation4] sm:$0xff]  ;;  %v186_v13 = vld [vmem:[#allocation4 + $0x8] sm:$0xff] }
  0x2c   :  { %v121_v24 = vshrl.u32 %v113_v16, 8  ;;  %v122_v25 = vshrl.u32 %v114_v17, 8  ;;  %v117_v26 = vxor.u32 %v109_v18, %v101_v10  ;;  %v118_v27 = vxor.u32 %v110_v19, %v102_v11 }
  0x2d   :  { %v123_v28 = vshrl.u32 %v115_v20, 8  ;;  %v124_v29 = vshrl.u32 %v116_v21, 8  ;;  %v119_v30 = vxor.u32 %v111_v22, %v103_v14  ;;  %v348_v31 = vxor.u32 %v112_v23, %v104_v15  ;;  %v187_v20 = vld [vmem:[#allocation4 + $0x10] sm:$0xff]  ;;  %v188_v21 = vld [vmem:[#allocation4 + $0x18] sm:$0xff] }
  0x2e   :  { %v129_v32 = vshrl.u32 %v121_v24, 16  ;;  %v130_v33 = vand.u32 65535, %v121_v24  ;;  %v135_v34 = vshrl.u32 %v122_v25, 16  ;;  %v136_v35 = vand.u32 65535, %v122_v25 }
  0x2f   :  { %v141_v36 = vshrl.u32 %v123_v28, 16  ;;  %v142_v37 = vand.u32 65535, %v123_v28  ;;  %v147_v38 = vshrl.u32 %v124_v29, 16  ;;  %v148_v39 = vand.u32 65535, %v124_v29 }
  0x30   :  { %v131_v40 = vcvt.s32.f32 %v129_v32  ;;  %v133_v41 = vcvt.s32.f32 %v130_v33  ;;  %v137_v42 = vcvt.s32.f32 %v135_v34  ;;  %v139_v43 = vcvt.s32.f32 %v136_v35 }
  0x31   :  { %v143_v44 = vcvt.s32.f32 %v141_v36  ;;  %v145_v45 = vcvt.s32.f32 %v142_v37  ;;  %v149_v46 = vcvt.s32.f32 %v147_v38  ;;  %v151_v47 = vcvt.s32.f32 %v148_v39 }
  0x32   :  { %v132_v48 = vmul.f32 65536.0, %v131_v40  ;;  %v138_v49 = vmul.f32 65536.0, %v137_v42  ;;  %v125_v50 = vshrl.u32 %v117_v26, 8  ;;  %v126_v51 = vshrl.u32 %v118_v27, 8  ;;  %v189_v42 = vld [vmem:[#allocation4 + $0x20] sm:$0xff] }
  0x33   :  { %v144_v52 = vmul.f32 65536.0, %v143_v44  ;;  %v150_v53 = vmul.f32 65536.0, %v149_v46  ;;  %v127_v54 = vshrl.u32 %v119_v30, 8  ;;  %v128_v55 = vshrl.u32 %v348_v31, 8 }
  0x34   :  { %v134_v56 = vadd.f32 %v133_v41, %v132_v48  ;;  %v140_v57 = vadd.f32 %v139_v43, %v138_v49  ;;  %v153_v58 = vshrl.u32 %v125_v50, 16  ;;  %v154_v59 = vand.u32 65535, %v125_v50 }
  0x35   :  { %v146_v60 = vadd.f32 %v145_v45, %v144_v52  ;;  %v152_v61 = vadd.f32 %v151_v47, %v150_v53  ;;  %v159_v62 = vshrl.u32 %v126_v51, 16  ;;  %v160_v63 = vand.u32 65535, %v126_v51  ;;  %v190_v47 = vld [vmem:[#allocation4 + $0x28] sm:$0xff] }
  0x36   :  { %v177_v0 = vmul.f32 5.9604645e-08, %v134_v56  ;;  %v178_v1 = vmul.f32 5.9604645e-08, %v140_v57  ;;  %v155_v2 = vcvt.s32.f32 %v153_v58  ;;  %v157_v3 = vcvt.s32.f32 %v154_v59  ;;  %v191_v58 = vld [vmem:[#allocation4 + $0x30] sm:$0xff] }
  0x37   :  { %v179_v4 = vmul.f32 5.9604645e-08, %v146_v60  ;;  %v180_v5 = vmul.f32 5.9604645e-08, %v152_v61  ;;  %v161_v6 = vcvt.s32.f32 %v159_v62  ;;  %v163_v7 = vcvt.s32.f32 %v160_v63 }
  0x38   :  { %v193_v8 = vmul.f32 2.0, %v177_v0  ;;  %v194_v9 = vmul.f32 2.0, %v178_v1  ;;  %v156_v10 = vmul.f32 65536.0, %v155_v2  ;;  %v165_v11 = vshrl.u32 %v127_v54, 16  ;;  %v192_v1 = vld [vmem:[#allocation4 + $0x38] sm:$0xff] }
  0x39   :  { %v195_v14 = vmul.f32 2.0, %v179_v4  ;;  %v196_v15 = vmul.f32 2.0, %v180_v5  ;;  %v162_v16 = vmul.f32 65536.0, %v161_v6  ;;  %v166_v17 = vand.u32 65535, %v127_v54 }
  0x3a   :  { %v256_v18 = vadd.f32 -1.0, %v193_v8  ;;  %v257_v19 = vadd.f32 -1.0, %v194_v9  ;;  %v158_v22 = vadd.f32 %v157_v3, %v156_v10  ;;  %v167_v23 = vcvt.s32.f32 %v165_v11 }
  0x3b   :  { %v258_v24 = vadd.f32 -1.0, %v195_v14  ;;  %v259_v25 = vadd.f32 -1.0, %v196_v15  ;;  %v164_v26 = vadd.f32 %v163_v7, %v162_v16  ;;  %v169_v27 = vcvt.s32.f32 %v166_v17 }
  0x3c   :  { %v209_v28 = vadd.f32 %v256_v18, %v185_v12  ;;  %v210_v29 = vadd.f32 %v257_v19, %v186_v13  ;;  %v181_v30 = vmul.f32 5.9604645e-08, %v158_v22  ;;  %v168_v32 = vmul.f32 65536.0, %v167_v23 }
  0x3d   :  { %v211_v33 = vadd.f32 %v258_v24, %v187_v20  ;;  %v212_v34 = vadd.f32 %v259_v25, %v188_v21  ;;  %v182_v35 = vmul.f32 5.9604645e-08, %v164_v26  ;;  %v171_v36 = vshrl.u32 %v128_v55, 16 }
  0x3e   :  { %vm217_vm0 = vcmp.ge.f32.partialorder %v209_v28, 0.0  ;;  %vm218_vm1 = vcmp.ge.f32.partialorder %v210_v29, 0.0  ;;  %v197_v37 = vmul.f32 2.0, %v181_v30  ;;  %v170_v38 = vadd.f32 %v169_v27, %v168_v32 }
  0x3f   :  { %v316_v39 = vmov -1.0   ;;  %vm219_vm2 = vcmp.ge.f32.partialorder %v211_v33, 0.0  ;;  %vm220_vm3 = vcmp.ge.f32.partialorder %v212_v34, 0.0  ;;  %v198_v46 = vmul.f32 2.0, %v182_v35 }
  0x40   :  { %v225_v40 = vsel %vm217_vm0, 1.0, %v316_v39  ;;  %v226_v41 = vsel %vm218_vm1, 1.0, %v316_v39  ;;  %v227_v43 = vsel %vm219_vm2, 1.0, %v316_v39  ;;  %v228_v44 = vsel %vm220_vm3, 1.0, %v316_v39 }
  0x41   :  { %233 = vst [vmem:[#allocation7] sm:$0xff] %v225_v40  ;;  %234 = vst [vmem:[#allocation7 + $0x8] sm:$0xff] %v226_v41  ;;  %v260_v45 = vadd.f32 -1.0, %v197_v37  ;;  %v183_v48 = vmul.f32 5.9604645e-08, %v170_v38  ;;  %v172_v49 = vand.u32 65535, %v128_v55  ;;  %v173_v50 = vcvt.s32.f32 %v171_v36 }
  0x42   :  { %235 = vst [vmem:[#allocation7 + $0x10] sm:$0xff] %v227_v43  ;;  %236 = vst [vmem:[#allocation7 + $0x18] sm:$0xff] %v228_v44  ;;  %v261_v52 = vadd.f32 -1.0, %v198_v46 }
  0x43   :  { %v213_v51 = vadd.f32 %v260_v45, %v189_v42  ;;  %v199_v53 = vmul.f32 2.0, %v183_v48  ;;  %v174_v54 = vmul.f32 65536.0, %v173_v50  ;;  %v175_v56 = vcvt.s32.f32 %v172_v49 }
  0x44   :  { %v214_v57 = vadd.f32 %v261_v52, %v190_v47 }
  0x45   :  { %vm221_vm4 = vcmp.ge.f32.partialorder %v213_v51, 0.0  ;;  %v262_v60 = vadd.f32 -1.0, %v199_v53  ;;  %v176_v61 = vadd.f32 %v175_v56, %v174_v54 }
  0x46   :  { %v229_v59 = vsel %vm221_vm4, 1.0, %v316_v39  ;;  %vm222_vm5 = vcmp.ge.f32.partialorder %v214_v57, 0.0 }
  0x47   :  { %237 = vst [vmem:[#allocation7 + $0x20] sm:$0xff] %v229_v59  ;;  %v230_v62 = vsel %vm222_vm5, 1.0, %v316_v39  ;;  %v215_v63 = vadd.f32 %v262_v60, %v191_v58  ;;  %v184_v0 = vmul.f32 5.9604645e-08, %v176_v61 }
  0x48   :  { %238 = vst [vmem:[#allocation7 + $0x28] sm:$0xff] %v230_v62 }
  0x49   :  { %vm223_vm6 = vcmp.ge.f32.partialorder %v215_v63, 0.0  ;;  %v200_v31 = vmul.f32 2.0, %v184_v0 }
  0x4a   :  { %v231_v55 = vsel %vm223_vm6, 1.0, %v316_v39 }
  0x4b   :  { %239 = vst [vmem:[#allocation7 + $0x30] sm:$0xff] %v231_v55  ;;  %v263_v2 = vadd.f32 -1.0, %v200_v31 }
  0x4d   :  { %v216_v3 = vadd.f32 %v263_v2, %v192_v1 }
  0x4f   :  { %vm224_vm7 = vcmp.ge.f32.partialorder %v216_v3, 0.0 }
  0x50   :  { %v232_v4 = vsel %vm224_vm7, 1.0, %v316_v39 }
  0x51   :  { %240 = vst [vmem:[#allocation7 + $0x38] sm:$0xff] %v232_v4 }
  0x52   :  { %300 = shalt.err (!%p297_p12)
}
  0x53   :  { %s301_s27 = scalar_lea.hbm %s369_s2, 1024 }
  0x54   :  { %p302_p13 = scmp.ne.s32.totalorder %s369_s2, %s301_s27  ;;  %p305_p0 = scmp.lt.u32.totalorder %s301_s27, %s369_s2 }
  0x56   :  { %p307_p1 = pnand %p305_p0, %p302_p13 }
  0x58   :  { %310 = shalt.err (!%p307_p1)
}
  0x59   :  { %250 = dma.vmem_to_hbm [thread:$0]  %s248_s1, 1024, %s369_s2, [#allocation6]  }
  0x5a   :  { %313 = dma.done.wait [#allocation6], 1024  }
  0x5b   :  { %314 = vsyncadd [#allocation6], 4294966272 }
  0x5c   :  { %254 = vsyncpa [#allocation5], 1 }
  0x5d   :  { %255 = vsyncpa [#allocation6], 1 }

</bundles_post_ra>
